<compile_context>
chip_gen: v6e
topology: v6e:2x2x1
jax: 0.10.0
libtpu: 0.0.40
codegen_flags: <defaults>
</compile_context>

<pallas_src>
import functools
import math

import jax
import jax.numpy as jnp
from jax import lax
from jax.experimental import pallas as pl
from jax.experimental.pallas import tpu as pltpu


_SQRT_HALF = 1.0 / math.sqrt(2.0)
_LN_EPS = 1e-12


def _head_transform_kernel(x_ref, w_ref, p_ref, o_ref):
    # x_ref: (tm, H)  activations for this row tile (matmul dtype)
    # w_ref: (H, H)   dense weight, already transposed to [in, out], resident in VMEM
    # p_ref: (3, H)   f32, rows = [bias, gamma, beta], resident in VMEM
    # o_ref: (tm, H)  output tile (input dtype)
    x = x_ref[...]
    w = w_ref[...]

    # MXU matmul in the input dtype, f32 accumulation. Plain (1,)x(0,)
    # contraction -- weight was transposed once in the wrapper.
    h = jnp.dot(x, w, preferred_element_type=jnp.float32)

    params = p_ref[...]
    bias = params[0:1, :]
    gamma = params[1:2, :]
    beta = params[2:3, :]

    h = h + bias

    # GELU (exact erf form, as used by BERT). f32 epilogue on all chips.
    h = 0.5 * h * (1.0 + lax.erf(h * _SQRT_HALF))

    # LayerNorm over hidden dim, eps = 1e-12. Single pass: E[h] and E[h^2]
    # are independent reductions (shorter dependency chain than
    # center-then-square); clamp var at 0 to guard mild cancellation.
    mean = jnp.mean(h, axis=-1, keepdims=True)
    mean_sq = jnp.mean(h * h, axis=-1, keepdims=True)
    var = jnp.maximum(mean_sq - mean * mean, 0.0)
    inv = lax.rsqrt(var + _LN_EPS)

    o_ref[...] = ((h - mean) * inv * gamma + beta).astype(o_ref.dtype)


def _round_up(x, m):
    return (x + m - 1) // m * m


def _cdiv(a, b):
    return (a + b - 1) // b


def _vmem_capacity_bytes():
    try:
        return int(pltpu.get_tpu_info().vmem_capacity_bytes)
    except Exception:
        return 64 << 20  # conservative: v7x per-TensorCore VMEM


def _choose_row_tile(M, H, in_isz, out_isz, tm_req, vmem_cap):
    """Pick (row tile, number of grid steps) given the VMEM budget."""
    # bf16 packs 16 rows per sublane-packed vreg; f32 packs 8.
    granule = 16 if in_isz < 4 else 8
    tm_req = max(granule, _round_up(tm_req, granule))

    # Keep 2-deep pipelined x/out tiles + resident weight/params under ~70% of
    # this chip's VMEM (weight budgeted at 2 copies for headroom).
    budget = int(0.70 * vmem_cap) - 2 * H * H * in_isz - 2 * 8 * H * 4
    per_row = 2 * H * (in_isz + out_isz)
    if budget > 0:
        tm_cap = max(granule, (budget // per_row) // granule * granule)
        tm_req = min(tm_req, tm_cap)
    # TODO(synk): if the resident HxH weight itself no longer fits in VMEM
    # (very large H, esp. on v7x's 64 MiB), tile the output-feature dim and
    # restructure the LayerNorm epilogue instead of keeping W fully resident.

    if M <= granule:
        return granule, 1
    # >=2 grid steps so ("parallel",) spans both TensorCores on v7x, and
    # balanced tiles so the last one is not mostly padding.
    num_tiles = max(2, _cdiv(M, tm_req))
    tm_eff = _round_up(_cdiv(M, num_tiles), granule)
    return tm_eff, num_tiles


@functools.partial(jax.jit, static_argnames=("tm", "matmul_dtype"))
def bert_prediction_head_transform(hidden_states, weight, bias, gamma, beta, *,
                                   tm=512, matmul_dtype=None):
    """hidden_states: [B, S, H]; weight: [H, H] (PyTorch nn.Linear layout
    [out, in]); bias/gamma/beta: [H]. Returns [B, S, H] in the input dtype.

    matmul_dtype: optional explicit dtype for the MXU matmul (e.g.
    jnp.bfloat16 on v5e for f32 activations). Default None keeps the input
    dtype so numerics match the reference exactly.
    """
    B, S, H = hidden_states.shape
    M = B * S
    out_dtype = hidden_states.dtype
    mm_dtype = jnp.dtype(out_dtype if matmul_dtype is None else matmul_dtype)
    in_isz = mm_dtype.itemsize
    out_isz = jnp.dtype(out_dtype).itemsize

    vmem_cap = _vmem_capacity_bytes()
    tm_eff, num_tiles = _choose_row_tile(M, H, in_isz, out_isz, tm, vmem_cap)
    Mp = num_tiles * tm_eff

    x2d = hidden_states.reshape(M, H).astype(mm_dtype)
    if Mp != M:
        x2d = jnp.pad(x2d, ((0, Mp - M), (0, 0)))

    # One-time transpose to [in, out]: a single H^2 HBM pass outside the grid
    # loop; the in-kernel contraction is then a plain MXU matmul.
    w_t = weight.T.astype(mm_dtype)

    # bias / gamma / beta packed into one small resident (3, H) f32 buffer.
    params = jnp.stack([bias, gamma, beta]).astype(jnp.float32)

    # Generation-aware scoped-VMEM limit: estimate (pipelined x/out tiles +
    # resident weight + params) with headroom, capped at 90% of physical VMEM.
    est = (2 * tm_eff * H * in_isz            # x tile, 2-deep pipeline
           + 2 * tm_eff * H * out_isz         # out tile, 2-deep pipeline
           + H * H * in_isz                   # resident weight (single copy)
           + 8 * H * 4)                       # params (sublane-padded)
    vmem_limit = int(min(max(2 * est + (2 << 20), 32 << 20), int(0.9 * vmem_cap)))

    out2d = pl.pallas_call(
        _head_transform_kernel,
        out_shape=jax.ShapeDtypeStruct((Mp, H), out_dtype),
        grid_spec=pltpu.PrefetchScalarGridSpec(
            num_scalar_prefetch=0,
            grid=(num_tiles,),
            in_specs=[
                # pipelined row tile of activations
                pl.BlockSpec((tm_eff, H), lambda i: (i, 0)),
                # grid-invariant operands: whole array resident in VMEM,
                # single copy (no double buffering of the HxH weight).
                pl.BlockSpec(memory_space=pltpu.MemorySpace.VMEM),
                pl.BlockSpec(memory_space=pltpu.MemorySpace.VMEM),
            ],
            out_specs=pl.BlockSpec((tm_eff, H), lambda i: (i, 0)),
        ),
        compiler_params=pltpu.CompilerParams(
            dimension_semantics=("parallel",),
            vmem_limit_bytes=vmem_limit,
        ),
    )(x2d, w_t, params)

    return out2d[:M].reshape(B, S, H)


def _reference(hidden_states, weight, bias, gamma, beta):
    h = jnp.einsum("bsh,oh->bso",
                   hidden_states.astype(jnp.float32),
                   weight.astype(jnp.float32),
                   precision=lax.Precision.HIGHEST) + bias
    h = 0.5 * h * (1.0 + lax.erf(h / jnp.sqrt(2.0)))
    mean = jnp.mean(h, axis=-1, keepdims=True)
    var = jnp.mean((h - mean) ** 2, axis=-1, keepdims=True)
    return (h - mean) / jnp.sqrt(var + 1e-12) * gamma + beta


if __name__ == "__main__":
    H = 32
    key = jax.random.PRNGKey(0)
    k_x, k_w, k_b, k_g, k_bt = jax.random.split(key, 5)

    # Deterministic synthetic parameters (PyTorch nn.Linear layout [out, in]).
    weight = jax.random.normal(k_w, (H, H), dtype=jnp.float32) * 0.02
    bias = jax.random.normal(k_b, (H,), dtype=jnp.float32) * 0.02
    gamma = 1.0 + 0.1 * jax.random.normal(k_g, (H,), dtype=jnp.float32)
    beta = 0.1 * jax.random.normal(k_bt, (H,), dtype=jnp.float32)

    # f32, tile-aligned token count (B=2, S=8 -> 16 rows).
    x = jax.random.normal(k_x, (2, 8, H), dtype=jnp.float32)
    out = jax.block_until_ready(
        bert_prediction_head_transform(x, weight, bias, gamma, beta))
    ref = _reference(x, weight, bias, gamma, beta)
    assert out.shape == x.shape
    assert jnp.allclose(out, ref, atol=1e-4, rtol=1e-4), "f32 mismatch vs reference"

    # f32, odd token count (exercises row padding / tile balancing).
    x_odd = jax.random.normal(k_x, (3, 5, H), dtype=jnp.float32)
    out_odd = jax.block_until_ready(
        bert_prediction_head_transform(x_odd, weight, bias, gamma, beta))
    ref_odd = _reference(x_odd, weight, bias, gamma, beta)
    assert jnp.allclose(out_odd, ref_odd, atol=1e-4, rtol=1e-4), "odd-M mismatch vs reference"

    # bf16 activations (exercises the 16-row granule and the bf16 MXU path).
    x_bf = x.astype(jnp.bfloat16)
    out_bf = jax.block_until_ready(
        bert_prediction_head_transform(x_bf, weight, bias, gamma, beta))
    ref_bf = _reference(x_bf.astype(jnp.float32),
                        weight.astype(jnp.bfloat16).astype(jnp.float32),
                        bias, gamma, beta)
    assert out_bf.dtype == jnp.bfloat16
    assert jnp.allclose(out_bf.astype(jnp.float32), ref_bf, atol=2e-2, rtol=2e-2), \
        "bf16 mismatch vs reference"

    print("KERNEL_OK")
</pallas_src>

<mosaic_0001>
module attributes {stable_mosaic.version = 11 : i64} {
  func.func @_head_transform_kernel(%arg0: i32, %arg1: memref<8x32xf32, #tpu.memory_space<vmem>>, %arg2: memref<32x32xf32, #tpu.memory_space<vmem>>, %arg3: memref<3x32xf32, #tpu.memory_space<vmem>>, %arg4: memref<8x32xf32, #tpu.memory_space<vmem>>) attributes {dimension_semantics = [#tpu.dimension_semantics<parallel>], iteration_bounds = array<i64: 2>, scalar_prefetch = 0 : i64, scratch_operands = 0 : i64, tpu.core_type = #tpu.core_type<tc>, window_params = [{transform_indices = @transform_0, window_bounds = array<i64: 8, 32>}, {pipeline_mode = #tpu.pipeline_mode<synchronous>, transform_indices = @transform_1, window_bounds = array<i64: 32, 32>}, {pipeline_mode = #tpu.pipeline_mode<synchronous>, transform_indices = @transform_2, window_bounds = array<i64: 3, 32>}, {transform_indices = @transform_3, window_bounds = array<i64: 8, 32>}]} {
    %c0 = arith.constant 0 : index
    %c0_0 = arith.constant 0 : index
    %0 = vector.load %arg1[%c0, %c0_0] : memref<8x32xf32, #tpu.memory_space<vmem>>, vector<8x32xf32>
    %c0_1 = arith.constant 0 : index
    %c0_2 = arith.constant 0 : index
    %1 = vector.load %arg2[%c0_1, %c0_2] : memref<32x32xf32, #tpu.memory_space<vmem>>, vector<32x32xf32>
    %cst = arith.constant dense<0.000000e+00> : vector<8x32xf32>
    %2 = tpu.matmul %0, %1, %cst {dimension_numbers = #tpu.dot_dimension_numbers<[1], [0], [0], [1], [0, 0, 1, 1], [], []>} : vector<8x32xf32>, vector<32x32xf32>, vector<8x32xf32> -> vector<8x32xf32>
    %c0_3 = arith.constant 0 : index
    %c0_4 = arith.constant 0 : index
    %3 = vector.load %arg3[%c0_3, %c0_4] : memref<3x32xf32, #tpu.memory_space<vmem>>, vector<3x32xf32>
    %4 = vector.extract_strided_slice %3 {offsets = [0, 0], sizes = [1, 32], strides = [1, 1]} : vector<3x32xf32> to vector<1x32xf32>
    %5 = vector.extract_strided_slice %3 {offsets = [1, 0], sizes = [1, 32], strides = [1, 1]} : vector<3x32xf32> to vector<1x32xf32>
    %6 = vector.extract_strided_slice %3 {offsets = [2, 0], sizes = [1, 32], strides = [1, 1]} : vector<3x32xf32> to vector<1x32xf32>
    %7 = vector.broadcast %4 : vector<1x32xf32> to vector<8x32xf32>
    %8 = arith.addf %2, %7 : vector<8x32xf32>
    %cst_5 = arith.constant 5.000000e-01 : f32
    %9 = vector.broadcast %cst_5 : f32 to vector<8x32xf32>
    %10 = arith.mulf %9, %8 : vector<8x32xf32>
    %cst_6 = arith.constant 0.707106769 : f32
    %11 = vector.broadcast %cst_6 : f32 to vector<8x32xf32>
    %12 = arith.mulf %8, %11 : vector<8x32xf32>
    %13 = math.erf %12 : vector<8x32xf32>
    %cst_7 = arith.constant 1.000000e+00 : f32
    %14 = vector.broadcast %cst_7 : f32 to vector<8x32xf32>
    %15 = arith.addf %14, %13 : vector<8x32xf32>
    %16 = arith.mulf %10, %15 : vector<8x32xf32>
    %cst_8 = arith.constant dense<0.000000e+00> : vector<8xf32>
    %17 = vector.multi_reduction <add>, %16, %cst_8 [1] : vector<8x32xf32> to vector<8xf32>
    %18 = vector.shape_cast %17 : vector<8xf32> to vector<8x1xf32>
    %cst_9 = arith.constant 3.200000e+01 : f32
    %19 = vector.broadcast %cst_9 : f32 to vector<8x1xf32>
    %20 = arith.divf %18, %19 : vector<8x1xf32>
    %21 = arith.mulf %16, %16 : vector<8x32xf32>
    %cst_10 = arith.constant dense<0.000000e+00> : vector<8xf32>
    %22 = vector.multi_reduction <add>, %21, %cst_10 [1] : vector<8x32xf32> to vector<8xf32>
    %23 = vector.shape_cast %22 : vector<8xf32> to vector<8x1xf32>
    %cst_11 = arith.constant 3.200000e+01 : f32
    %24 = vector.broadcast %cst_11 : f32 to vector<8x1xf32>
    %25 = arith.divf %23, %24 : vector<8x1xf32>
    %26 = arith.mulf %20, %20 : vector<8x1xf32>
    %27 = arith.subf %25, %26 : vector<8x1xf32>
    %cst_12 = arith.constant 0.000000e+00 : f32
    %28 = vector.broadcast %cst_12 : f32 to vector<8x1xf32>
    %29 = arith.maximumf %27, %28 : vector<8x1xf32>
    %cst_13 = arith.constant 9.99999996E-13 : f32
    %30 = vector.broadcast %cst_13 : f32 to vector<8x1xf32>
    %31 = arith.addf %29, %30 : vector<8x1xf32>
    %32 = math.rsqrt %31 : vector<8x1xf32>
    %33 = vector.broadcast %20 : vector<8x1xf32> to vector<8x32xf32>
    %34 = arith.subf %16, %33 : vector<8x32xf32>
    %35 = vector.broadcast %32 : vector<8x1xf32> to vector<8x32xf32>
    %36 = arith.mulf %34, %35 : vector<8x32xf32>
    %37 = vector.broadcast %5 : vector<1x32xf32> to vector<8x32xf32>
    %38 = arith.mulf %36, %37 : vector<8x32xf32>
    %39 = vector.broadcast %6 : vector<1x32xf32> to vector<8x32xf32>
    %40 = arith.addf %38, %39 : vector<8x32xf32>
    %c0_14 = arith.constant 0 : index
    %c0_15 = arith.constant 0 : index
    %41 = vector.load %arg4[%c0_14, %c0_15] : memref<8x32xf32, #tpu.memory_space<vmem>>, vector<8x32xf32>
    tpu.vector_store %arg4[%c0_14, %c0_15], %40 {strides = array<i32>} : memref<8x32xf32, #tpu.memory_space<vmem>>, vector<8x32xf32>,
    return
  }
  func.func @transform_0(%arg0: i32) -> (i32, i32) {
    %c0_i32 = arith.constant 0 : i32
    %c0_i32_0 = arith.constant 0 : i32
    return %arg0, %c0_i32 : i32, i32
  }
  func.func @transform_1(%arg0: i32) -> (i32, i32) {
    %c0_i32 = arith.constant 0 : i32
    %c0_i32_0 = arith.constant 0 : i32
    %c0_i32_1 = arith.constant 0 : i32
    return %c0_i32, %c0_i32_0 : i32, i32
  }
  func.func @transform_2(%arg0: i32) -> (i32, i32) {
    %c0_i32 = arith.constant 0 : i32
    %c0_i32_0 = arith.constant 0 : i32
    %c0_i32_1 = arith.constant 0 : i32
    return %c0_i32, %c0_i32_0 : i32, i32
  }
  func.func @transform_3(%arg0: i32) -> (i32, i32) {
    %c0_i32 = arith.constant 0 : i32
    %c0_i32_0 = arith.constant 0 : i32
    return %arg0, %c0_i32 : i32, i32
  }
}

</mosaic_0001>

<bundles_post_ra>
// kernel: bert_prediction_head_transform.1
= control target key start
LH: loop header
LB: loop body
LE: loop exit
PB: predicated region body
PF: predicated region fallthrough
CT: control target
= control target key end

     0   :  { %8 = vsyncpa [#allocation3], 0  ;;  %s619_s0 = inlined_call_operand.vmem [shape: f32[16,32], index: 0, kind: input, shape index: {}]   ;;  %s620_s1 = inlined_call_operand.vmem [shape: f32[32,32], index: 1, kind: input, shape index: {}]   ;;  %s621_s2 = inlined_call_operand.vmem [shape: f32[3,32], index: 2, kind: input, shape index: {}]   ;;  %s622_s3 = inlined_call_operand.hbm [shape: f32[16,32], index: 3, kind: output, shape index: {}]  }
   0x1   :  { %10 = vsyncpa [#allocation3 + $0x1], 0  ;;  %s513_s12 = smov 0   ;;  %s515_s13 = smov 0  }
   0x2   :  { %s517_s14 = smov 0   ;;  %s519_s15 = smov 0  }
   0x3 LB: > { %s534_s16 = sadd.s32 4294967295, %s488_s15   ;;  %s356_s17 = sadd.s32 4294967294, %s488_s15   ;;  %s488_s15 = sphi %s519_s15, %s628_s15   ;;  %s484_s14 = sphi %s517_s14, %s627_s14   ;;  %s480_s13 = sphi %s515_s13, %s626_s13   ;;  %s476_s12 = sphi %s513_s12, %s625_s12  }
   0x4   : > { %s538_s18 = sadd.s32 1, %s488_s15   ;;  %s91_s19 = sadd.s32 1, %s484_s14 }
   0x5   : > { %s88_s20 = ssub.s32 %s488_s15, %s538_s18  ;;  %p101_p0 = scmp.ne.s32.totalorder %s484_s14, %s480_s13 }
   0x6   : > { %p89_p1 = scmp.eq.s32.totalorder %s88_s20, 0  ;;  %p102_p2 = scmp.eq.s32.totalorder %s534_s16, 1 }
   0x7   : > { %p107_p3 = scmp.ne.s32.totalorder %s480_s13, %s476_s12  ;;  %p108_p4 = scmp.eq.s32.totalorder %s356_s17, 1 }
   0x8   : > { %s549_s21 = scalar_select %p89_p1, %s484_s14, %s91_s19  }
   0x9   : > { %p551_p5 = por %p102_p2, %p101_p0  ;;  %p555_p6 = por %p108_p4, %p107_p3 }
   0xa   : > { %p359_p7 = scmp.ge.s32.totalorder %s488_s15, 1  ;;  %p139_p8 = scmp.lt.s32.totalorder %s488_s15, 3 }
   0xc   : > { %p140_p9 = pnand %p359_p7, %p139_p8 }
   0xd   : > { %p162_p10 = scmp.lt.s32.totalorder (!%p140_p9), %s534_s16, 1  ;;  %s159_s17 = sand.u32 (!%p140_p9), 1, %s480_s13  }
   0xe   : > { %143 = sbr.rel (%p140_p9) target bundleno = 427 (0x1ab), region = 32  ;;  %s360_s19 = sshll.u32 (!%p140_p9), %s159_s17, 3 }
   0xf   : > { %s364_s20 = sshll.u32 (!%p140_p9), %s534_s16, 7  ;;  %s161_s24 = scalar_lea.vmem (!%p140_p9), [#allocation2], %s360_s19 }
  0x10   : > { %s297_s25 = sshll.u32 (!%p140_p9), %s161_s24, 4  ;;  %s284_s29 = scalar_lea.sflag (!%p140_p9), [#allocation3], %s159_s17  ;;  %s298_s25 = int_to_ptr.vmem [resolvable:$true] %s297_s25 }
  0x11   : > { %s428_s30 = scalar_lea.vmem (!%p140_p9), %s298_s25, 128 }
  0x12   : > { %p429_p11 = scmp.ne.s32.totalorder (!%p140_p9), %s298_s25, %s428_s30 }
  0x13   : > { %v170_v0 = vld [vmem:[%s620_s1 + $0x18] sm:$0xff]  ;;  %v490_v1 = vmov 0.0   ;;  %v169_v2 = vld [vmem:[%s620_s1 + $0x10] sm:$0xff]  ;;  %vm491_vm0 = vmmov 0   ;;  %s163_s28 = scalar_select %p162_p10, %s534_s16, 1  ;;  %v168_v3 = vld [vmem:[%s620_s1 + $0x8] sm:$0xff]  ;;  %v172_v6 = vlaneseq }
  0x14   : > { %372 = vmatprep.subr.mxu0 %v490_v1  ;;  %380 = vmatprep.mubr.msk.f32.mxu0 %vm491_vm0, %v490_v1  ;;  %v167_v4 = vld [vmem:[%s620_s1] sm:$0xff]  ;;  %vm176_vm1 = vcmask 261120   ;;  %p430_p12 = pnand %p429_p11, %p551_p5 }
  0x15   : > { %373 = vmatpush3.msra.mxu0 %v170_v0  ;;  %s361_s4 = sshll.u32 %s163_s28, 3  ;;  %v173_v7 = vshrl.u32 %v172_v6, 7  ;;  %v171_v9 = vld [vmem:[%s621_s2] sm:$0x7]  ;;  %s295_s28 = scalar_lea.hbm %s622_s3, %s364_s20 }
  0x16   : > { %374 = vmatprep.subr.mxu0 %v490_v1  ;;  %s165_s9 = scalar_lea.vmem %s619_s0, %s361_s4  ;;  %p431_p13 = pneg %p430_p12 }
  0x17   : > { %375 = vmatpush3.msra.mxu0 %v169_v2  ;;  %v166_v5 = vld [vmem:[%s165_s9] sm:$0xff]  ;;  %v174_v8 = vsub.s32 0, %v173_v7  ;;  %v274_v30 = vsub.s32 1, %v173_v7  ;;  %v279_v31 = vsub.s32 2, %v173_v7  ;;  %s492_s4 = smov [#allocation2]  }
  0x18   : > { %376 = vmatprep.subr.mxu0 %v490_v1  ;;  %s432_s5 = sshll.u32 %s492_s4, 4  ;;  %s433_s5 = int_to_ptr.vmem [resolvable:$false] %s432_s5 }
  0x19   : > { %377 = vmatpush3.msra.mxu0 %v168_v3  ;;  %v175_v10 = vrot.slane %v171_v9, %v174_v8  ;;  %v275_v32 = vrot.slane %v171_v9, %v274_v30  ;;  %v280_v35 = vrot.slane %v171_v9, %v279_v31  ;;  %s434_s16 = scalar_lea.vmem %s433_s5, 256  ;;  %p435_p0 = scmp.lt.s32.totalorder %s298_s25, %s433_s5 }
  0x1a   : > { %378 = vmatprep.subr.mxu0 %v490_v1  ;;  %p436_p1 = scmp.lt.s32.totalorder %s434_s16, %s428_s30 }
  0x1b   : > { %379 = vmatpush3.msra.mxu0 %v167_v4 }
  0x1c   : > { %381 = vmatmul.mubr.msk.f32.vlgmr.msra.gmra.mxu0 %vm176_vm1, %v166_v5  ;;  %p437_p2 = por %p436_p1, %p435_p0 }
  0x1e   : > { %p438_p3 = pnand %p437_p2, %p431_p13 }
  0xdc   : > { %v246_v11 = vpop.f32.mrf.mxu0 }
  0xdd   : > { %v247_v12 = vadd.f32 %v246_v11, %v175_v10 }
  0xde   : > { %v382_v13 = vpop.f32.mrf.mxu0 }
  0xdf   : > { %v251_v14 = vmul.f32 0.70710677, %v247_v12  ;;  %v250_v16 = vmul.f32 0.5, %v247_v12 }
  0xe1   : > { %424 = verf.f32 %v251_v14 }
  0xee   : > { %v425_v15 = vpop.eup %424 }
  0xef   : > { %v253_v17 = vadd.f32 1.0, %v425_v15 }
  0xf1   : > { %v254_v18 = vmul.f32 %v253_v17, %v250_v16 }
  0xf3   : > { %v255_v19 = vsel %vm176_vm1, %v254_v18, 0.0  ;;  %v260_v20 = vmul.f32 %v254_v18, %v254_v18 }
  0xf4   : > { %256 = vadd.xlane.f32.xlu0 %v255_v19 }
  0xf5   : > { %v261_v21 = vsel %vm176_vm1, %v260_v20, 0.0 }
  0xf8   : > { %262 = vadd.xlane.f32.xlu0 %v261_v21 }
 0x17d   : > { %v257_v22 = vpop.xlane.xlu0 %256 }
 0x17e   : > { %v259_v23 = vmul.f32 0.03125, %v257_v22 }
 0x180   : > { %v265_v25 = vmul.f32 %v259_v23, %v259_v23  ;;  %v270_v33 = vsub.f32 %v254_v18, %v259_v23 }
 0x181   : > { %v263_v24 = vpop.xlane.xlu0 %262 }
 0x182   : > { %v264_v26 = vmul.f32 0.03125, %v263_v24 }
 0x184   : > { %v266_v27 = vsub.f32 %v264_v26, %v265_v25 }
 0x186   : > { %v267_v28 = vmax.f32 %v266_v27, 0.0 }
 0x188   : > { %v268_v29 = vadd.f32 1e-12, %v267_v28 }
 0x18a   : > { %426 = vrsqrt.f32 %v268_v29 }
 0x197   : > { %v427_v34 = vpop.eup %426 }
 0x198   : > { %v271_v36 = vmul.f32 %v427_v34, %v270_v33 }
 0x19a   : > { %v276_v37 = vmul.f32 %v275_v32, %v271_v36 }
 0x19c   : > { %v281_v38 = vadd.f32 %v280_v35, %v276_v37 }
 0x19e   : > { %282 = vst.msk [vmem:[%s161_s24] sm:$0xff] %vm176_vm1, %v281_v38 }
 0x19f   : > { %441 = shalt.err (!%p438_p3)
}
 0x1a0   : > { %s442_s6 = scalar_lea.hbm %s295_s28, 128  ;;  %s446_s9 = scalar_lea.hbm %s622_s3, 256 }
 0x1a1   : > { %p443_p4 = scmp.ne.s32.totalorder %s295_s28, %s442_s6  ;;  %p447_p9 = scmp.lt.s32.totalorder %s295_s28, %s622_s3 }
 0x1a2   : > { %p448_p10 = scmp.lt.s32.totalorder %s446_s9, %s442_s6 }
 0x1a3   : > { %p444_p7 = pnand %p443_p4, %p551_p5 }
 0x1a4   : > { %p449_p11 = por %p448_p10, %p447_p9 }
 0x1a5   : > { %p445_p8 = pneg %p444_p7 }
 0x1a7   : > { %p450_p12 = pnand %p449_p11, %p445_p8 }
 0x1a9   : > { %453 = shalt.err (!%p450_p12)
}
 0x1aa   : > { %383 = dma.vmem_to_hbm [thread:$0]  (%p551_p5), %s298_s25, 128, %s295_s28, %s284_s29  }
 0x1ab PF: > { %p389_p13 = scmp.ge.s32.totalorder %s488_s15, 2  ;;  %s309_s17 = sand.u32 1, %s476_s12  }
 0x1ac   : > { %s310_s19 = scalar_lea.sflag [#allocation3], %s309_s17 }
 0x1ad   : > { %p386_p0 = pnand %p389_p13, %p555_p6 }
 0x1af   : > { %p387_p1 = pneg %p386_p0 }
 0x1b1   : > { %471 = dma.done.wait (%p387_p1), %s310_s19, 128  }
 0x1b2   : > { %473 = vsyncadd (%p387_p1), %s310_s19, 4294967168  ;;  %p13_p2 = scmp.ge.s32.totalorder %s538_s18, 4   ;;  %s625_s12 = smov %s480_s13 }
 0x1b3   : > { %s626_s13 = smov %s484_s14  ;;  %s627_s14 = smov %s549_s21 }
 0x1b4   : > { %s628_s15 = smov %s538_s18  ;;  %15 = sbr.rel (!%p13_p2) target bundleno = 3 (0x3), region = 67 }
 0x1b9   :  { %315 = vsyncpa [#allocation3], 1 }
 0x1ba   :  { %317 = vsyncpa [#allocation3 + $0x1], 1 }

</bundles_post_ra>
